<compile_context>
chip_gen: v6e
topology: v6e:2x2x1
jax: 0.10.0
libtpu: 0.0.40
codegen_flags: <defaults>
</compile_context>

<pallas_src>
import functools
import math

import jax
import jax.numpy as jnp
from jax.experimental import pallas as pl
from jax.experimental.pallas import tpu as pltpu

_MIN_GRID_STEPS = 8          # keep 2 TCs + the DMA pipeline busy
_MIN_PAIR_BYTES = 512 << 10  # below this per (in+out) block pair, overhead dominates


def _round_up(x, m):
    return (x + m - 1) // m * m


def _padded_block_bytes(block_shape, itemsize):
    """Padded VMEM footprint of one block: last dim pads to 128 lanes,
    second-to-last to 8 sublanes (approximation; sub-32-bit dtypes pack)."""
    dims = list(block_shape)
    if len(dims) >= 1:
        dims[-1] = _round_up(dims[-1], 128)
    if len(dims) >= 2:
        dims[-2] = _round_up(dims[-2], 8)
    return math.prod(dims) * itemsize


def _chip_vmem_bytes():
    try:
        return int(pltpu.get_tpu_info().vmem_capacity_bytes)
    except Exception:
        return 64 << 20  # conservative (64 MiB-class) if the query is unavailable


def _budget():
    """(target bytes for one in+out block pair, vmem_limit_bytes)."""
    cap = _chip_vmem_bytes()
    if cap > (64 << 20):          # v5e / v6e: 128 MiB physical VMEM
        return 8 << 20, 64 << 20  # ~4 MiB per buffer
    return 4 << 20, 32 << 20      # v7x-class: ~2 MiB per buffer


def _pick_h_tile(B, C, H, W, itemsize, pair_target):
    """H-tile (multiple of 8, or H itself) sized from the *padded* VMEM
    footprint of one input + one output block; keeps enough grid steps for
    megacore sharding as long as blocks stay above the overhead floor."""
    per8 = (_padded_block_bytes((1, C, 8, W), itemsize)
            + _padded_block_bytes((1, 8, W * C), itemsize))
    th = 8 * max(1, pair_target // per8)
    # Prefer >= _MIN_GRID_STEPS total grid steps when blocks remain big enough.
    min_steps_h = max(1, -(-_MIN_GRID_STEPS // B))
    th_for_steps = _round_up(max(1, -(-H // min_steps_h)), 8)
    if th_for_steps * per8 // 8 >= _MIN_PAIR_BYTES:
        th = min(th, th_for_steps)
    if th >= H:
        return H  # full-extent block along H (always legal)
    return th


def _nchw_to_nhwc_kernel(x_ref, o_ref):
    # x_ref: (1, C, TH, W) ; o_ref: (1, TH, W*C)
    # Move C to the minor axis, then merge (W, C) into one lane-dense axis so
    # the store path uses full-width vector stores.
    # TODO(synk): fuse transpose + minor-dim merge into a single
    # pltpu.einshape relayout once the grouped equation form is verified.
    x = x_ref[...]
    o_ref[...] = jnp.transpose(x, (0, 2, 3, 1)).reshape(o_ref.shape)


def _permute_block_kernel(x_ref, o_ref, *, perm):
    o_ref[...] = jnp.transpose(x_ref[...], perm)


def permute(x: jax.Array, perm, *, h_tile=None) -> jax.Array:
    """Pallas equivalent of torch.Tensor.permute(*perm)."""
    perm = tuple(int(p) for p in perm)
    ndim = x.ndim
    assert sorted(perm) == list(range(ndim)), "perm must be a permutation"
    if perm == tuple(range(ndim)):
        return x

    out_shape = tuple(x.shape[p] for p in perm)
    itemsize = jnp.dtype(x.dtype).itemsize
    pair_target, vmem_limit = _budget()
    cost = pl.CostEstimate(flops=0, transcendentals=0,
                           bytes_accessed=2 * x.size * itemsize)

    # ---- Fast path: NCHW -> NHWC (canonical SVMamba Permute(0, 2, 3, 1)). ----
    if ndim == 4 and perm == (0, 2, 3, 1):
        B, C, H, W = x.shape
        if h_tile is not None:  # test-only override (e.g. to force ragged tiles)
            TH = H if h_tile >= H else _round_up(h_tile, 8)
        else:
            TH = _pick_h_tile(B, C, H, W, itemsize, pair_target)
        pair_bytes = (_padded_block_bytes((1, C, TH, W), itemsize)
                      + _padded_block_bytes((1, TH, W * C), itemsize))
        if 2 * pair_bytes + (2 << 20) > vmem_limit:
            # TODO(synk): tile W/C as well for extreme per-row footprints.
            return jnp.transpose(x, perm)

        grid = (pl.cdiv(H, TH), B)  # many-step axis first -> both TCs get work at B=1
        out_flat = pl.pallas_call(
            _nchw_to_nhwc_kernel,
            out_shape=jax.ShapeDtypeStruct((B, H, W * C), x.dtype),
            grid=grid,
            in_specs=[pl.BlockSpec((1, C, TH, W), lambda h, b: (b, 0, h, 0))],
            out_specs=pl.BlockSpec((1, TH, W * C), lambda h, b: (b, h, 0)),
            compiler_params=pltpu.CompilerParams(
                dimension_semantics=("parallel", "parallel"),
                vmem_limit_bytes=int(vmem_limit)),
            cost_estimate=cost,
        )(x)
        # Metadata-only reshape back to NHWC.
        return out_flat.reshape(B, H, W, C)

    # ---- Generic leading-batch permutation: grid over the shared axis 0. ----
    if ndim >= 3 and perm[0] == 0:
        B = x.shape[0]
        in_block = (1,) + x.shape[1:]
        out_block = (1,) + out_shape[1:]
        pair_bytes = (_padded_block_bytes(in_block, itemsize)
                      + _padded_block_bytes(out_block, itemsize))
        if 2 * pair_bytes + (2 << 20) > vmem_limit:
            # TODO(synk): tile the largest non-minor axis instead of bailing to
            # XLA for very large per-batch slices.
            return jnp.transpose(x, perm)

        kernel = functools.partial(_permute_block_kernel, perm=perm)

        def idx(b):
            return (b,) + (0,) * (ndim - 1)

        return pl.pallas_call(
            kernel,
            out_shape=jax.ShapeDtypeStruct(out_shape, x.dtype),
            grid=(B,),
            in_specs=[pl.BlockSpec(in_block, idx)],
            out_specs=pl.BlockSpec(out_block, idx),
            compiler_params=pltpu.CompilerParams(
                dimension_semantics=("parallel",),
                vmem_limit_bytes=int(vmem_limit)),
            cost_estimate=cost,
        )(x)

    # ---- Fallback: whole array as a single block (small arrays only). ----
    pair_bytes = (_padded_block_bytes(x.shape, itemsize)
                  + _padded_block_bytes(out_shape, itemsize))
    if 2 * pair_bytes + (2 << 20) > vmem_limit:
        # An unpipelined one-block Pallas call loses to XLA's transpose here.
        return jnp.transpose(x, perm)

    kernel = functools.partial(_permute_block_kernel, perm=perm)
    return pl.pallas_call(
        kernel,
        out_shape=jax.ShapeDtypeStruct(out_shape, x.dtype),
        in_specs=[pl.BlockSpec(x.shape, lambda: (0,) * ndim)],
        out_specs=pl.BlockSpec(out_shape, lambda: (0,) * ndim),
        compiler_params=pltpu.CompilerParams(vmem_limit_bytes=int(vmem_limit)),
        cost_estimate=cost,
    )(x)


class Permute:
    """Mirror of the PyTorch module: Permute(*args)(x) == x.permute(*args)."""

    def __init__(self, *args):
        self.args = args

    def __call__(self, x):
        return permute(x, self.args)


if __name__ == "__main__":
    key = jax.random.PRNGKey(0)

    # Canonical SVMamba usage: NCHW -> NHWC, small shapes.
    x = jax.random.normal(key, (2, 4, 16, 16), dtype=jnp.float32)
    out = jax.block_until_ready(Permute(0, 2, 3, 1)(x))
    ref = jnp.transpose(x, (0, 2, 3, 1))
    assert out.shape == (2, 16, 16, 4), out.shape
    assert out.dtype == x.dtype
    assert jnp.array_equal(out, ref), "NCHW->NHWC permute mismatch"

    # Larger per-batch slice with B=1: exercises TH < H tiling and the
    # (H-tiles, B) grid ordering (many-step axis leading).
    x_big = jax.random.normal(jax.random.PRNGKey(1), (1, 64, 128, 128),
                              dtype=jnp.float32)
    out_big = jax.block_until_ready(permute(x_big, (0, 2, 3, 1)))
    assert jnp.array_equal(out_big, jnp.transpose(x_big, (0, 2, 3, 1)))

    # Ragged H tiling (H not a multiple of the tile) -> masked edge block.
    x_rag = jax.random.normal(jax.random.PRNGKey(2), (1, 8, 40, 16),
                              dtype=jnp.float32)
    out_rag = jax.block_until_ready(permute(x_rag, (0, 2, 3, 1), h_tile=16))
    assert jnp.array_equal(out_rag, jnp.transpose(x_rag, (0, 2, 3, 1)))

    # Generic batch-leading permutation (NHWC -> NCHW).
    out2 = jax.block_until_ready(Permute(0, 3, 1, 2)(x))
    assert jnp.array_equal(out2, jnp.transpose(x, (0, 3, 1, 2)))

    # Non-batch-leading permutation -> whole-array fallback path.
    out3 = jax.block_until_ready(Permute(2, 0, 3, 1)(x))
    assert jnp.array_equal(out3, jnp.transpose(x, (2, 0, 3, 1)))

    print("KERNEL_OK")
</pallas_src>

<mosaic_0001>
module attributes {stable_mosaic.version = 11 : i64} {
  func.func @_nchw_to_nhwc_kernel(%arg0: i32, %arg1: i32, %arg2: memref<1x4x16x16xf32, #tpu.memory_space<vmem>>, %arg3: memref<1x16x64xf32, #tpu.memory_space<vmem>>) attributes {dimension_semantics = [#tpu.dimension_semantics<parallel>, #tpu.dimension_semantics<parallel>], iteration_bounds = array<i64: 1, 2>, scalar_prefetch = 0 : i64, scratch_operands = 0 : i64, tpu.core_type = #tpu.core_type<tc>, window_params = [{transform_indices = @transform_0, window_bounds = array<i64: 1, 4, 16, 16>}, {transform_indices = @transform_1, window_bounds = array<i64: 1, 16, 64>}]} {
    %c0 = arith.constant 0 : index
    %c0_0 = arith.constant 0 : index
    %c0_1 = arith.constant 0 : index
    %c0_2 = arith.constant 0 : index
    %0 = vector.load %arg2[%c0, %c0_0, %c0_1, %c0_2] : memref<1x4x16x16xf32, #tpu.memory_space<vmem>>, vector<1x4x16x16xf32>
    %1 = tpu.transpose %0, [0, 2, 3, 1] : vector<1x4x16x16xf32> -> vector<1x16x16x4xf32>
    %2 = vector.shape_cast %1 : vector<1x16x16x4xf32> to vector<1x16x64xf32>
    %c0_3 = arith.constant 0 : index
    %c0_4 = arith.constant 0 : index
    %c0_5 = arith.constant 0 : index
    %3 = vector.load %arg3[%c0_3, %c0_4, %c0_5] : memref<1x16x64xf32, #tpu.memory_space<vmem>>, vector<1x16x64xf32>
    tpu.vector_store %arg3[%c0_3, %c0_4, %c0_5], %2 {strides = array<i32>} : memref<1x16x64xf32, #tpu.memory_space<vmem>>, vector<1x16x64xf32>,
    return
  }
  func.func @transform_0(%arg0: i32, %arg1: i32) -> (i32, i32, i32, i32) {
    %c0_i32 = arith.constant 0 : i32
    %c0_i32_0 = arith.constant 0 : i32
    %c0_i32_1 = arith.constant 0 : i32
    return %arg1, %c0_i32, %arg0, %c0_i32_0 : i32, i32, i32, i32
  }
  func.func @transform_1(%arg0: i32, %arg1: i32) -> (i32, i32, i32) {
    %c0_i32 = arith.constant 0 : i32
    %c0_i32_0 = arith.constant 0 : i32
    return %arg1, %arg0, %c0_i32 : i32, i32, i32
  }
}

</mosaic_0001>

<bundles_post_ra>
// kernel: tpu_custom_call.1
= control target key start
LH: loop header
LB: loop body
LE: loop exit
PB: predicated region body
PF: predicated region fallthrough
CT: control target
= control target key end

     0   :  { %6 = vsyncpa [#allocation3], 0  ;;  %s3016_s0 = inlined_call_operand.hbm [shape: f32[2,4,16,16], index: 0, kind: input, shape index: {}]   ;;  %s3017_s1 = inlined_call_operand.hbm [shape: f32[2,16,64], index: 1, kind: output, shape index: {}]  }
   0x1   :  { %8 = vsyncpa [#allocation3 + $0x1], 0 }
   0x2   :  { %9 = vsyncpa [#allocation4], 0 }
   0x3   :  { %11 = vsyncpa [#allocation4 + $0x1], 0  ;;  %s2573_s6 = smov 0   ;;  %s2575_s7 = smov 0  }
   0x4   :  { %s2577_s8 = smov 0   ;;  %s2579_s9 = smov 0  }
   0x5   :  { %s2581_s10 = smov 0   ;;  %s2583_s11 = smov 0  }
   0x6 LB: > { %s2298_s12 = sadd.s32 4294967295, %s2538_s11   ;;  %s2299_s13 = sadd.s32 4294967294, %s2538_s11   ;;  %s2538_s11 = sphi %s2583_s11, %s17_s11   ;;  %s2534_s10 = sphi %s2581_s10, %s3028_s10   ;;  %s2530_s9 = sphi %s2579_s9, %s3027_s9   ;;  %s2526_s8 = sphi %s2577_s8, %s3026_s8   ;;  %s2522_s7 = sphi %s2575_s7, %s3025_s7   ;;  %s2518_s6 = sphi %s2573_s6, %s3024_s6  }
   0x7   : > { %s26_s14 = sadd.s32 1, %s2534_s10  ;;  %s38_s15 = sadd.s32 1, %s2526_s8 }
   0x8   : > { %p27_p0 = scmp.ge.s32.totalorder %s26_s14, 2  ;;  %p45_p1 = scmp.ne.s32.totalorder %s2526_s8, %s2522_s7 }
   0x9   : > { %p46_p2 = scmp.eq.s32.totalorder %s2538_s11, 0  ;;  %p51_p3 = scmp.ne.s32.totalorder %s2522_s7, %s2518_s6 }
   0xa   : > { %s3030_s14 = smov (%p27_p0, %s26_s14), 0  ;;  %p52_p5 = scmp.eq.s32.totalorder %s2298_s12, 0 }
   0xb   : > { %p2614_p4 = por %p46_p2, %p45_p1  ;;  %s33_s17 = ssub.s32 %s2534_s10, %s3030_s14 }
   0xc   : > { %p77_p6 = scmp.eq.s32.totalorder %s2298_s12, 1  ;;  %p36_p7 = scmp.eq.s32.totalorder %s33_s17, 0 }
   0xd   : > { %p2620_p8 = por %p52_p5, %p51_p3  ;;  %p83_p10 = scmp.eq.s32.totalorder %s2299_s13, 1 }
   0xe   : > { %p2624_p9 = por %p77_p6, %p45_p1  ;;  %p2359_p13 = scmp.lt.s32.totalorder %s2538_s11, 2 }
   0xf   : > { %s2629_s20 = scalar_select %p36_p7, %s2526_s8, %s38_s15  }
  0x10   : > { %p2631_p11 = por %p83_p10, %p51_p3  ;;  %s103_s22 = sand.u32 1, %s2526_s8  }
  0x11   : > { %s2302_s23 = sshll.u32 %s103_s22, 6  ;;  %s2345_s24 = sshll.u32 %s2534_s10, 10 }
  0x12   : > { %s115_s27 = scalar_lea.hbm %s3016_s0, %s2345_s24  ;;  %s107_s28 = scalar_lea.vmem [#allocation2], %s2302_s23 }
  0x13   : > { %s116_s29 = sshll.u32 %s107_s28, 4  ;;  %p2644_p0 = pnand %p2359_p13, %p2614_p4  ;;  %s117_s29 = int_to_ptr.vmem [resolvable:$true] %s116_s29 }
  0x14   : > { %p2305_p1 = scmp.ge.s32.totalorder %s2538_s11, 1  ;;  %s104_s2 = scalar_lea.sflag [#allocation3], %s103_s22 }
  0x15   : > { %p2432_p2 = pneg %p2644_p0  ;;  %s2443_s3 = scalar_lea.vmem %s117_s29, 1024 }
  0x16   : > { %p2444_p3 = scmp.ne.s32.totalorder %s117_s29, %s2443_s3  ;;  %s2540_s4 = smov [#allocation2]  }
  0x17   : > { %s2448_s5 = sshll.u32 %s2540_s4, 4  ;;  %s2449_s5 = int_to_ptr.vmem [resolvable:$false] %s2448_s5 }
  0x18   : > { %p2446_p5 = pnand %p2444_p3, %p2432_p2  ;;  %s2450_s12 = scalar_lea.vmem %s2449_s5, 2048 }
  0x19   : > { %p2451_p7 = scmp.lt.s32.totalorder %s117_s29, %s2449_s5  ;;  %p2452_p10 = scmp.lt.s32.totalorder %s2450_s12, %s2443_s3 }
  0x1a   : > { %p2447_p6 = pneg %p2446_p5 }
  0x1b   : > { %p2453_p12 = por %p2452_p10, %p2451_p7 }
  0x1d   : > { %p2454_p4 = pnand %p2453_p12, %p2447_p6 }
  0x1f   : > { %2457 = shalt.err (!%p2454_p4)
}
  0x20   : > { %s2541_s13 = smov 128   ;;  %s2542_s15 = smov 8  }
  0x21   : > { %2354 = dma.hbm_to_vmem [thread:$0]  (!%p2644_p0), %s115_s27, 1024, %s117_s29, %s104_s2, %s2541_s13, %s2541_s13, %s2542_s15  }
  0x22   : > { %p124_p13 = scmp.lt.s32.totalorder %s2538_s11, 3 }
  0x24   : > { %p125_p2 = pnand %p2305_p1, %p124_p13 }
  0x25   : > { %s2657_s16 = sand.u32 (!%p125_p2), 1, %s2522_s7  }
  0x26   : > { %128 = sbr.rel (%p125_p2) target bundleno = 546 (0x222), region = 24  ;;  %s2306_s17 = sshll.u32 (!%p125_p2), %s2657_s16, 6 }
  0x27   : > { %s131_s22 = scalar_lea.sflag (!%p125_p2), [#allocation3], %s2657_s16  ;;  %s134_s23 = scalar_lea.vmem (!%p125_p2), [#allocation2], %s2306_s17 }
  0x2b   : > { %2509 = dma.done.wait (%p2620_p8), %s131_s22, 1024  }
  0x2c   : > { %2511 = vsyncadd (%p2620_p8), %s131_s22, 4294966272  ;;  %v157_v0 = vld [vmem:[%s134_s23 + $0x10] sm:$0xff]  ;;  %v155_v1 = vld [vmem:[%s134_s23] sm:$0xff]  ;;  %v2543_v8 = vmov 1983009808   ;;  %v296_v10 = vlaneseq  ;;  %v2545_v35 = vmov 0.0  }
  0x2d   : > { %195 = vxpose.xlu1.b32.start [1/2] (short) (narrow) %v157_v0, 16  ;;  %163 = vxpose.xlu0.b32.start [1/2] (short) (narrow) %v155_v1, 16  ;;  %v158_v2 = vld [vmem:[%s134_s23 + $0x18] sm:$0xff]  ;;  %v156_v3 = vld [vmem:[%s134_s23 + $0x8] sm:$0xff]  ;;  %v161_v4 = vld [vmem:[%s134_s23 + $0x30] sm:$0xff]  ;;  %v294_v9 = vunpack.c.l.s4 %v2543_v8  ;;  %s2546_s18 = smov 8  }
  0x2e   : > { %v159_v5 = vld [vmem:[%s134_s23 + $0x20] sm:$0xff]  ;;  %v162_v6 = vld [vmem:[%s134_s23 + $0x38] sm:$0xff]  ;;  %v160_v7 = vld [vmem:[%s134_s23 + $0x28] sm:$0xff]  ;;  %v297_v14 = vshrl.u32 %v296_v10, 7  ;;  %v2544_v17 = vmov 1934713408  }
  0x2f   : > { %v295_v13 = vunpack.c.0.s8 %v294_v9  ;;  %v326_v18 = vunpack.c.l.s4 %v2544_v17  ;;  %s2547_s24 = smov 4   ;;  %s2548_s25 = smov 12   ;;  %vm2147_vm0 = vcmask 31744   ;;  %vm2150_vm1 = vcmask 64512  }
  0x30   : > { %s2549_s26 = smov 16   ;;  %s2550_s27 = smov 20   ;;  %vm2153_vm2 = vcmask 97280   ;;  %vm2156_vm3 = vcmask 130048   ;;  %vm2159_vm4 = vcmask 162816   ;;  %vm2162_vm5 = vcmask 195584  }
  0x31   : > { %196 = vxpose.xlu1.b32.end [2/2] (short) (narrow) %v158_v2, 16  ;;  %164 = vxpose.xlu0.b32.end [2/2] (short) (narrow) %v156_v3, 16  ;;  %v2665_v19 = vsub.s32 %v295_v13, %v297_v14  ;;  %v327_v22 = vunpack.c.0.s8 %v326_v18  ;;  %s2551_s28 = smov 24   ;;  %s2552_s29 = smov 28   ;;  %vm2165_vm6 = vcmask 228352   ;;  %vm2168_vm7 = vcmask 261120  }
  0x32   : > { %s2553_s30 = smov 32   ;;  %s2554_s2 = smov 36   ;;  %vm2171_vm8 = vcmask 293888   ;;  %vm2174_vm9 = vcmask 326656   ;;  %vm2177_vm10 = vcmask 359424   ;;  %vm2180_vm11 = vcmask 392192  }
  0x33   : > { %v2669_v29 = vsub.s32 %v327_v22, %v297_v14  ;;  %s2555_s3 = smov 40   ;;  %s2556_s4 = smov 44   ;;  %vm2183_vm12 = vcmask 424960   ;;  %vm2186_vm13 = vcmask 457728   ;;  %vm2189_vm14 = vcmask 490496  }
  0x34   : > { %s2557_s5 = smov 48   ;;  %s2558_s12 = smov 52   ;;  %vm2192_vm15 = vcmask 523264  }
  0x35   : > { %259 = vxpose.xlu1.b32.start [1/2] (short) (narrow) %v161_v4, 16  ;;  %227 = vxpose.xlu0.b32.start [1/2] (short) (narrow) %v159_v5, 16  ;;  %s2559_s13 = smov 56   ;;  %s2560_s15 = smov 60  }
  0x36   : > { %s2307_s17 = sshll.u32 %s2657_s16, 4 }
  0x37   : > { %s152_s22 = scalar_lea.vmem [#allocation5], %s2307_s17 }
  0x38   : > { %s2211_s23 = sshll.u32 %s152_s22, 4  ;;  %s2959_s23 = int_to_ptr.vmem [resolvable:$true] %s2211_s23 }
  0x39   : > { %260 = vxpose.xlu1.b32.end [2/2] (short) (narrow) %v162_v6, 16  ;;  %228 = vxpose.xlu0.b32.end [2/2] (short) (narrow) %v160_v7, 16 }
  0xa9   : > { %v211_v11 = vpop.trf.xlu1  ;;  %v179_v12 = vpop.trf.xlu0 }
  0xad   : > { %v212_v15 = vpop.trf.xlu1  ;;  %v180_v16 = vpop.trf.xlu0 }
  0xb1   : > { %v275_v20 = vpop.trf.xlu1  ;;  %v243_v21 = vpop.trf.xlu0 }
  0xb2   : > { %v307_v23 = vcombine.low %v211_v11, %v275_v20  ;;  %v291_v24 = vcombine.low %v179_v12, %v243_v21  ;;  %v308_v27 = vcombine.high %v211_v11, %v275_v20  ;;  %v292_v28 = vcombine.high %v179_v12, %v243_v21 }
  0xb4   : > { %v315_v25 = vrot.slane %v307_v23, %v2665_v19  ;;  %v299_v26 = vrot.slane %v291_v24, %v2665_v19  ;;  %v322_v32 = vrot.slane %v308_v27, %v2665_v19  ;;  %v306_v33 = vrot.slane %v292_v28, %v2665_v19 }
  0xb5   : > { %v276_v37 = vpop.trf.xlu1  ;;  %v244_v38 = vpop.trf.xlu0 }
  0xb6   : > { %v323_v30 = vcombine.low %v299_v26, %v315_v25  ;;  %v324_v31 = vcombine.high %v299_v26, %v315_v25  ;;  %v339_v40 = vcombine.low %v306_v33, %v322_v32  ;;  %v375_v41 = vcombine.low %v212_v15, %v276_v37 }
  0xb7   : > { %v359_v42 = vcombine.low %v180_v16, %v244_v38  ;;  %v340_v45 = vcombine.high %v306_v33, %v322_v32  ;;  %v376_v51 = vcombine.high %v212_v15, %v276_v37  ;;  %v360_v52 = vcombine.high %v180_v16, %v244_v38 }
  0xb8   : > { %v331_v34 = vrot.slane %v323_v30, %v2669_v29  ;;  %v338_v39 = vrot.slane %v324_v31, %v2669_v29  ;;  %v347_v44 = vrot.slane %v339_v40, %v2669_v29  ;;  %v383_v46 = vrot.slane %v375_v41, %v2665_v19 }
  0xb9   : > { %v367_v47 = vrot.slane %v359_v42, %v2665_v19  ;;  %v354_v49 = vrot.slane %v340_v45, %v2669_v29  ;;  %v390_v56 = vrot.slane %v376_v51, %v2665_v19  ;;  %v374_v57 = vrot.slane %v360_v52, %v2665_v19 }
  0xba   : > { %427 = vxpose.xlu0.b32.start.end [1/1] (short) (narrow) %v331_v34, 16  ;;  %v355_v36 = vcombine.high %v331_v34, %v2545_v35  ;;  %v356_v43 = vcombine.high %v338_v39, %v2545_v35  ;;  %v357_v48 = vcombine.high %v347_v44, %v2545_v35 }
  0xbb   : > { %v391_v50 = vcombine.low %v367_v47, %v383_v46  ;;  %v358_v53 = vcombine.high %v354_v49, %v2545_v35  ;;  %v392_v55 = vcombine.high %v367_v47, %v383_v46  ;;  %v407_v60 = vcombine.low %v374_v57, %v390_v56 }
  0xbc   : > { %459 = vxpose.xlu1.b32.start.end [1/1] (short) (narrow) %v355_v36, 16  ;;  %v408_v63 = vcombine.high %v374_v57, %v390_v56 }
  0xbd   : > { %v399_v54 = vrot.slane %v391_v50, %v2669_v29  ;;  %v406_v59 = vrot.slane %v392_v55, %v2669_v29  ;;  %v415_v62 = vrot.slane %v407_v60, %v2669_v29 }
  0xbe   : > { %v422_v1 = vrot.slane %v408_v63, %v2669_v29 }
  0xbf   : > { %491 = vxpose.xlu0.b32.start.end [1/1] (short) (narrow) %v338_v39, 16  ;;  %v423_v58 = vcombine.high %v399_v54, %v2545_v35  ;;  %v424_v61 = vcombine.high %v406_v59, %v2545_v35  ;;  %v425_v0 = vcombine.high %v415_v62, %v2545_v35 }
  0xc0   : > { %v426_v2 = vcombine.high %v422_v1, %v2545_v35 }
  0xc1   : > { %523 = vxpose.xlu1.b32.start.end [1/1] (short) (narrow) %v356_v43, 16 }
  0xc4   : > { %555 = vxpose.xlu0.b32.start.end [1/1] (short) (narrow) %v347_v44, 16 }
  0xc6   : > { %587 = vxpose.xlu1.b32.start.end [1/1] (short) (narrow) %v357_v48, 16 }
  0xc9   : > { %619 = vxpose.xlu0.b32.start.end [1/1] (short) (narrow) %v354_v49, 16 }
  0xcb   : > { %651 = vxpose.xlu1.b32.start.end [1/1] (short) (narrow) %v358_v53, 16 }
  0xce   : > { %683 = vxpose.xlu0.b32.start.end [1/1] (short) (narrow) %v399_v54, 16 }
  0xd0   : > { %715 = vxpose.xlu1.b32.start.end [1/1] (short) (narrow) %v423_v58, 16 }
  0xd3   : > { %747 = vxpose.xlu0.b32.start.end [1/1] (short) (narrow) %v406_v59, 16 }
  0xd5   : > { %779 = vxpose.xlu1.b32.start.end [1/1] (short) (narrow) %v424_v61, 16 }
  0xd8   : > { %811 = vxpose.xlu0.b32.start.end [1/1] (short) (narrow) %v415_v62, 16 }
  0xda   : > { %843 = vxpose.xlu1.b32.start.end [1/1] (short) (narrow) %v425_v0, 16 }
  0xdd   : > { %875 = vxpose.xlu0.b32.start.end [1/1] (short) (narrow) %v422_v1, 16 }
  0xdf   : > { %907 = vxpose.xlu1.b32.start.end [1/1] (short) (narrow) %v426_v2, 16 }
 0x136   : > { %v443_v3 = vpop.trf.xlu0 }
 0x138   : > { %v475_v4 = vpop.trf.xlu1 }
 0x13a   : > { %v444_v5 = vpop.trf.xlu0 }
 0x13c   : > { %v476_v6 = vpop.trf.xlu1 }
 0x13e   : > { %v507_v7 = vpop.trf.xlu0 }
 0x13f   : > { %v939_v8 = vcombine.low %v443_v3, %v507_v7  ;;  %v940_v9 = vcombine.high %v443_v3, %v507_v7 }
 0x140   : > { %v539_v10 = vpop.trf.xlu1 }
 0x141   : > { %v955_v11 = vcombine.low %v475_v4, %v539_v10  ;;  %v956_v12 = vcombine.high %v475_v4, %v539_v10  ;;  %v947_v14 = vrot.slane %v939_v8, %v2665_v19  ;;  %v954_v15 = vrot.slane %v940_v9, %v2665_v19 }
 0x142   : > { %v508_v13 = vpop.trf.xlu0 }
 0x143   : > { %v963_v16 = vrot.slane %v955_v11, %v2665_v19  ;;  %v970_v17 = vrot.slane %v956_v12, %v2665_v19  ;;  %v1211_v18 = vcombine.low %v444_v5, %v508_v13  ;;  %v1212_v20 = vcombine.high %v444_v5, %v508_v13 }
 0x144   : > { %v540_v21 = vpop.trf.xlu1 }
 0x145   : > { %v1003_v22 = vcombine.low %v947_v14, %v963_v16  ;;  %v1004_v23 = vcombine.high %v947_v14, %v963_v16  ;;  %v1019_v24 = vcombine.low %v954_v15, %v970_v17  ;;  %v1020_v25 = vcombine.high %v954_v15, %v970_v17 }
 0x146   : > { %v1227_v26 = vcombine.low %v476_v6, %v540_v21  ;;  %v1228_v27 = vcombine.high %v476_v6, %v540_v21  ;;  %v571_v28 = vpop.trf.xlu0  ;;  %v1219_v34 = vrot.slane %v1211_v18, %v2665_v19  ;;  %v1226_v35 = vrot.slane %v1212_v20, %v2665_v19 }
 0x147   : > { %v1011_v30 = vrot.slane %v1003_v22, %v2669_v29  ;;  %v1018_v31 = vrot.slane %v1004_v23, %v2669_v29  ;;  %v1027_v32 = vrot.slane %v1019_v24, %v2669_v29  ;;  %v1034_v33 = vrot.slane %v1020_v25, %v2669_v29 }
 0x148   : > { %v1235_v36 = vrot.slane %v1227_v26, %v2665_v19  ;;  %v1242_v37 = vrot.slane %v1228_v27, %v2665_v19  ;;  %v603_v38 = vpop.trf.xlu1 }
 0x149   : > { %v2308_v39 = vcombine.low %v1011_v30, %v1018_v31  ;;  %v2310_v40 = vcombine.high %v1011_v30, %v1018_v31  ;;  %v2312_v41 = vcombine.low %v1027_v32, %v1034_v33  ;;  %v2314_v42 = vcombine.high %v1027_v32, %v1034_v33 }
 0x14a   : > { %v1275_v43 = vcombine.low %v1219_v34, %v1235_v36  ;;  %v1276_v44 = vcombine.high %v1219_v34, %v1235_v36  ;;  %v1291_v45 = vcombine.low %v1226_v35, %v1242_v37  ;;  %v1292_v46 = vcombine.high %v1226_v35, %v1242_v37  ;;  %v572_v47 = vpop.trf.xlu0 }
 0x14b   : > { %v1491_v48 = vrot.slane %v2308_v39, %v2665_v19  ;;  %v1507_v49 = vrot.slane %v2310_v40, %v2665_v19  ;;  %v1523_v50 = vrot.slane %v2312_v41, %v2665_v19  ;;  %v1539_v51 = vrot.slane %v2314_v42, %v2665_v19 }
 0x14c   : > { %v1283_v52 = vrot.slane %v1275_v43, %v2669_v29  ;;  %v1290_v53 = vrot.slane %v1276_v44, %v2669_v29  ;;  %v1299_v54 = vrot.slane %v1291_v45, %v2669_v29  ;;  %v1306_v55 = vrot.slane %v1292_v46, %v2669_v29  ;;  %v604_v56 = vpop.trf.xlu1 }
 0x14d   : > { %v1548_v57 = vcombine.high %v1491_v48, %v1507_v49  ;;  %v1580_v58 = vcombine.high %v1523_v50, %v1539_v51  ;;  %v1547_v59 = vcombine.low %v1491_v48, %v1507_v49  ;;  %v1579_v60 = vcombine.low %v1523_v50, %v1539_v51 }
 0x14e   : > { %v2316_v61 = vcombine.low %v1283_v52, %v1290_v53  ;;  %v2318_v62 = vcombine.high %v1283_v52, %v1290_v53  ;;  %v2320_v63 = vcombine.low %v1299_v54, %v1306_v55  ;;  %v2322_v0 = vcombine.high %v1299_v54, %v1306_v55  ;;  %v635_v1 = vpop.trf.xlu0 }
 0x14f   : > { %v971_v2 = vcombine.low %v571_v28, %v635_v1  ;;  %v972_v3 = vcombine.high %v571_v28, %v635_v1  ;;  %v1562_v4 = vrot.slane %v1548_v57, %v2669_v29  ;;  %v1594_v5 = vrot.slane %v1580_v58, %v2669_v29 }
 0x150   : > { %v667_v6 = vpop.trf.xlu1  ;;  %v2708_v7 = vrot.slane %v1547_v59, %v2669_v29  ;;  %v2711_v8 = vrot.slane %v1579_v60, %v2669_v29  ;;  %v2714_v9 = vrot.slane %v2316_v61, %v2665_v19  ;;  %v2717_v10 = vrot.slane %v2318_v62, %v2665_v19 }
 0x151   : > { %v979_v11 = vrot.slane %v971_v2, %v2665_v19  ;;  %v987_v12 = vcombine.low %v603_v38, %v667_v6  ;;  %v988_v13 = vcombine.high %v603_v38, %v667_v6  ;;  %v986_v14 = vrot.slane %v972_v3, %v2665_v19 }
 0x152   : > { %v636_v15 = vpop.trf.xlu0  ;;  %v1613_v16 = vcombine.low %v1562_v4, %v1594_v5  ;;  %v1612_v17 = vcombine.high %v2708_v7, %v2711_v8  ;;  %v1614_v18 = vcombine.high %v1562_v4, %v1594_v5  ;;  %v2728_v25 = vrot.slane %v2320_v63, %v2665_v19 }
 0x153   : > { %v995_v20 = vrot.slane %v987_v12, %v2665_v19  ;;  %v1002_v21 = vrot.slane %v988_v13, %v2665_v19  ;;  %v1243_v22 = vcombine.low %v572_v47, %v636_v15  ;;  %v1244_v23 = vcombine.high %v572_v47, %v636_v15 }
 0x154   : > { %2037 = vrot.lane.b32.xlu1 %v1613_v16, %s2546_s18  ;;  %2029 = vrot.lane.b32.xlu0 %v1612_v17, %s2547_s24  ;;  %v668_v24 = vpop.trf.xlu1  ;;  %v2731_v26 = vrot.slane %v2322_v0, %v2665_v19  ;;  %v1684_v27 = vcombine.high %v2714_v9, %v2717_v10 }
 0x155   : > { %v1035_v28 = vcombine.low %v979_v11, %v995_v20  ;;  %v1036_v30 = vcombine.high %v979_v11, %v995_v20  ;;  %v1051_v31 = vcombine.low %v986_v14, %v1002_v21  ;;  %v1052_v32 = vcombine.high %v986_v14, %v1002_v21 }
 0x156   : > { %v1251_v33 = vrot.slane %v1243_v22, %v2665_v19  ;;  %v1258_v34 = vrot.slane %v1244_v23, %v2665_v19  ;;  %v1259_v35 = vcombine.low %v604_v56, %v668_v24  ;;  %v1260_v36 = vcombine.high %v604_v56, %v668_v24  ;;  %v699_v37 = vpop.trf.xlu0 }
 0x157   : > { %v1043_v38 = vrot.slane %v1035_v28, %v2669_v29  ;;  %v1050_v39 = vrot.slane %v1036_v30, %v2669_v29  ;;  %v1059_v40 = vrot.slane %v1051_v31, %v2669_v29  ;;  %v1066_v41 = vrot.slane %v1052_v32, %v2669_v29 }
 0x158   : > { %v1267_v42 = vrot.slane %v1259_v35, %v2665_v19  ;;  %v1274_v43 = vrot.slane %v1260_v36, %v2665_v19  ;;  %2045 = vrot.lane.b32.xlu1 %v1614_v18, %s2548_s25  ;;  %v2745_v44 = vrot.slane %v1684_v27, %v2669_v29  ;;  %v1716_v45 = vcombine.high %v2728_v25, %v2731_v26  ;;  %v731_v46 = vpop.trf.xlu1 }
 0x159   : > { %v2309_v47 = vcombine.low %v1043_v38, %v1050_v39  ;;  %v2311_v48 = vcombine.high %v1043_v38, %v1050_v39  ;;  %v2313_v49 = vcombine.low %v1059_v40, %v1066_v41  ;;  %v2315_v50 = vcombine.high %v1059_v40, %v1066_v41 }
 0x15a   : > { %v1307_v51 = vcombine.low %v1251_v33, %v1267_v42  ;;  %v1308_v52 = vcombine.high %v1251_v33, %v1267_v42  ;;  %v1323_v53 = vcombine.low %v1258_v34, %v1274_v43  ;;  %v1324_v54 = vcombine.high %v1258_v34, %v1274_v43  ;;  %v700_v55 = vpop.trf.xlu0 }
 0x15b   : > { %v2750_v56 = vrot.slane %v1716_v45, %v2669_v29  ;;  %v2753_v57 = vrot.slane %v2309_v47, %v2665_v19  ;;  %v2756_v58 = vrot.slane %v2311_v48, %v2665_v19  ;;  %v2759_v59 = vrot.slane %v2313_v49, %v2665_v19 }
 0x15c   : > { %v1315_v60 = vrot.slane %v1307_v51, %v2669_v29  ;;  %v1322_v61 = vrot.slane %v1308_v52, %v2669_v29  ;;  %v1331_v62 = vrot.slane %v1323_v53, %v2669_v29  ;;  %v1338_v63 = vrot.slane %v1324_v54, %v2669_v29  ;;  %v732_v0 = vpop.trf.xlu1 }
 0x15d   : > { %v1750_v1 = vcombine.high %v2745_v44, %v2750_v56  ;;  %v2768_v2 = vrot.slane %v2315_v50, %v2665_v19  ;;  %v1563_v3 = vcombine.low %v2753_v57, %v2756_v58  ;;  %v1564_v42 = vcombine.high %v2753_v57, %v2756_v58 }
 0x15e   : > { %v2317_v4 = vcombine.low %v1315_v60, %v1322_v61  ;;  %v2319_v5 = vcombine.high %v1315_v60, %v1322_v61  ;;  %v2321_v6 = vcombine.low %v1331_v62, %v1338_v63  ;;  %v2323_v11 = vcombine.high %v1331_v62, %v1338_v63  ;;  %v763_v12 = vpop.trf.xlu0 }
 0x15f   : > { %2047 = vrot.lane.b32.xlu0 %v1750_v1, %s2548_s25  ;;  %v1075_v13 = vcombine.low %v699_v37, %v763_v12  ;;  %v1076_v14 = vcombine.high %v699_v37, %v763_v12  ;;  %v1571_v15 = vrot.slane %v1563_v3, %v2669_v29  ;;  %v1595_v16 = vcombine.low %v2759_v59, %v2768_v2 }
 0x160   : > { %v795_v17 = vpop.trf.xlu1  ;;  %v2777_v18 = vrot.slane %v2317_v4, %v2665_v19  ;;  %v2780_v20 = vrot.slane %v2319_v5, %v2665_v19  ;;  %v2783_v21 = vrot.slane %v2321_v6, %v2665_v19  ;;  %v1682_v22 = vrot.slane %v2323_v11, %v2665_v19 }
 0x161   : > { %v1083_v23 = vrot.slane %v1075_v13, %v2665_v19  ;;  %v1091_v24 = vcombine.low %v731_v46, %v795_v17  ;;  %v1092_v27 = vcombine.high %v731_v46, %v795_v17  ;;  %v1090_v28 = vrot.slane %v1076_v14, %v2665_v19 }
 0x162   : > { %v764_v30 = vpop.trf.xlu0  ;;  %v1603_v31 = vrot.slane %v1595_v16, %v2669_v29  ;;  %v1699_v32 = vcombine.low %v2777_v18, %v2780_v20  ;;  %v1731_v33 = vcombine.low %v2783_v21, %v1682_v22  ;;  %v1596_v62 = vcombine.high %v2759_v59, %v2768_v2 }
 0x163   : > { %v1099_v34 = vrot.slane %v1091_v24, %v2665_v19  ;;  %v1106_v35 = vrot.slane %v1092_v27, %v2665_v19  ;;  %v1347_v36 = vcombine.low %v700_v55, %v764_v30  ;;  %v1348_v37 = vcombine.high %v700_v55, %v764_v30 }
 0x164   : > { %v1615_v38 = vcombine.low %v1571_v15, %v1603_v31  ;;  %v796_v39 = vpop.trf.xlu1  ;;  %v1707_v40 = vrot.slane %v1699_v32, %v2669_v29  ;;  %v1739_v41 = vrot.slane %v1731_v33, %v2669_v29  ;;  %v1616_v51 = vcombine.high %v1571_v15, %v1603_v31 }
 0x165   : > { %v1139_v43 = vcombine.low %v1083_v23, %v1099_v34  ;;  %v1140_v45 = vcombine.high %v1083_v23, %v1099_v34  ;;  %v1155_v46 = vcombine.low %v1090_v28, %v1106_v35  ;;  %v1156_v47 = vcombine.high %v1090_v28, %v1106_v35 }
 0x166   : > { %2053 = vrot.lane.b32.xlu1 %v1615_v38, %s2549_s26  ;;  %v1363_v48 = vcombine.low %v732_v0, %v796_v39  ;;  %v1364_v49 = vcombine.high %v732_v0, %v796_v39  ;;  %v827_v50 = vpop.trf.xlu0  ;;  %v1355_v54 = vrot.slane %v1347_v36, %v2665_v19  ;;  %v1362_v55 = vrot.slane %v1348_v37, %v2665_v19 }
 0x167   : > { %v2799_v52 = vrot.slane %v1139_v43, %v2669_v29  ;;  %v2802_v53 = vrot.slane %v1140_v45, %v2669_v29  ;;  %v1751_v60 = vcombine.low %v1707_v40, %v1739_v41  ;;  %v2811_v63 = vrot.slane %v1155_v46, %v2669_v29 }
 0x168   : > { %v1371_v57 = vrot.slane %v1363_v48, %v2665_v19  ;;  %v1378_v58 = vrot.slane %v1364_v49, %v2665_v19  ;;  %v859_v61 = vpop.trf.xlu1  ;;  %v2814_v0 = vrot.slane %v1156_v47, %v2669_v29  ;;  %v1578_v1 = vrot.slane %v1564_v42, %v2669_v29 }
 0x169   : > { %v1683_v3 = vcombine.low %v2714_v9, %v2717_v10  ;;  %v2324_v59 = vcombine.low %v2799_v52, %v2802_v53  ;;  %2055 = vrot.lane.b32.xlu0 %v1751_v60, %s2549_s26  ;;  %v1610_v2 = vrot.slane %v1596_v62, %v2669_v29  ;;  %v1700_v13 = vcombine.high %v2777_v18, %v2780_v20 }
 0x16a   : > { %v1411_v4 = vcombine.low %v1355_v54, %v1371_v57  ;;  %v1412_v5 = vcombine.high %v1355_v54, %v1371_v57  ;;  %v1427_v6 = vcombine.low %v1362_v55, %v1378_v58  ;;  %v1428_v11 = vcombine.high %v1362_v55, %v1378_v58  ;;  %2061 = vrot.lane.b32.xlu1 %v1616_v51, %s2550_s27  ;;  %v828_v12 = vpop.trf.xlu0 }
 0x16b   : > { %v1732_v14 = vcombine.high %v2783_v21, %v1682_v22  ;;  %v1617_v23 = vcombine.low %v1578_v1, %v1610_v2  ;;  %v1752_v24 = vcombine.high %v1707_v40, %v1739_v41  ;;  %v1714_v27 = vrot.slane %v1700_v13, %v2669_v29 }
 0x16c   : > { %v1419_v9 = vrot.slane %v1411_v4, %v2669_v29  ;;  %v1426_v10 = vrot.slane %v1412_v5, %v2669_v29  ;;  %v1435_v15 = vrot.slane %v1427_v6, %v2669_v29  ;;  %v1442_v16 = vrot.slane %v1428_v11, %v2669_v29  ;;  %v860_v17 = vpop.trf.xlu1 }
 0x16d   : > { %v1746_v28 = vrot.slane %v1732_v14, %v2669_v29  ;;  %v2326_v18 = vcombine.high %v2799_v52, %v2802_v53  ;;  %2063 = vrot.lane.b32.xlu0 %v1752_v24, %s2550_s27  ;;  %v1618_v33 = vcombine.high %v1578_v1, %v1610_v2  ;;  %v2834_v37 = vrot.slane %v1683_v3, %v2669_v29 }
 0x16e   : > { %v2332_v20 = vcombine.low %v1419_v9, %v1426_v10  ;;  %v2334_v21 = vcombine.high %v1419_v9, %v1426_v10  ;;  %v2336_v22 = vcombine.low %v1435_v15, %v1442_v16  ;;  %v891_v30 = vpop.trf.xlu0  ;;  %2069 = vrot.lane.b32.xlu1 %v1617_v23, %s2551_s28  ;;  %v2338_v34 = vcombine.high %v1435_v15, %v1442_v16 }
 0x16f   : > { %v1107_v31 = vcombine.low %v827_v50, %v891_v30  ;;  %v1108_v32 = vcombine.high %v827_v50, %v891_v30  ;;  %v1753_v35 = vcombine.low %v1714_v27, %v1746_v28  ;;  %v1715_v38 = vcombine.low %v2728_v25, %v2731_v26 }
 0x170   : > { %v923_v36 = vpop.trf.xlu1  ;;  %v2844_v46 = vrot.slane %v2332_v20, %v2665_v19  ;;  %v2847_v47 = vrot.slane %v2334_v21, %v2665_v19  ;;  %v2850_v48 = vrot.slane %v2336_v22, %v2665_v19  ;;  %v1947_v55 = vrot.slane %v2338_v34, %v2665_v19 }
 0x171   : > { %v1115_v39 = vrot.slane %v1107_v31, %v2665_v19  ;;  %v1122_v40 = vrot.slane %v1108_v32, %v2665_v19  ;;  %v1123_v41 = vcombine.low %v859_v61, %v923_v36  ;;  %v1124_v42 = vcombine.high %v859_v61, %v923_v36  ;;  %2071 = vrot.lane.b32.xlu0 %v1753_v35, %s2551_s28  ;;  %s2458_s28 = scalar_lea.vmem %s2959_s23, 256 }
 0x172   : > { %v892_v43 = vpop.trf.xlu0  ;;  %v2841_v45 = vrot.slane %v1715_v38, %v2669_v29  ;;  %2077 = vrot.lane.b32.xlu1 %v1618_v33, %s2552_s29  ;;  %v1955_v57 = vcombine.low %v2844_v46, %v2847_v47  ;;  %v2328_v1 = vcombine.low %v2811_v63, %v2814_v0  ;;  %v1754_v3 = vcombine.high %v1714_v27, %v1746_v28  ;;  %p2459_p8 = scmp.ne.s32.totalorder %s2959_s23, %s2458_s28 }
 0x173   : > { %v1131_v25 = vrot.slane %v1123_v41, %v2665_v19  ;;  %v1138_v26 = vrot.slane %v1124_v42, %v2665_v19  ;;  %v1379_v49 = vcombine.low %v828_v12, %v892_v43  ;;  %v1380_v50 = vcombine.high %v828_v12, %v892_v43 }
 0x174   : > { %v1748_v51 = vcombine.high %v2834_v37, %v2841_v45  ;;  %v924_v54 = vpop.trf.xlu1  ;;  %v2330_v6 = vcombine.high %v2811_v63, %v2814_v0  ;;  %v1749_v2 = vcombine.low %v2745_v44, %v2750_v56  ;;  %v1987_v10 = vcombine.low %v2850_v48, %v1947_v55  ;;  %p2460_p12 = pnand %p2459_p8, %p2624_p9 }
 0x175   : > { %v1171_v58 = vcombine.low %v1115_v39, %v1131_v25  ;;  %v1172_v60 = vcombine.high %v1115_v39, %v1131_v25  ;;  %v1187_v61 = vcombine.low %v1122_v40, %v1138_v26  ;;  %v1188_v62 = vcombine.high %v1122_v40, %v1138_v26  ;;  %2079 = vrot.lane.b32.xlu0 %v1754_v3, %s2552_s29  ;;  %s2561_s29 = smov [#allocation5]  }
 0x176   : > { %v1395_v4 = vcombine.low %v860_v17, %v924_v54  ;;  %v1396_v5 = vcombine.high %v860_v17, %v924_v54  ;;  %v1387_v11 = vrot.slane %v1379_v49, %v2665_v19  ;;  %v1394_v12 = vrot.slane %v1380_v50, %v2665_v19  ;;  %2031 = vrot.lane.b32.xlu1 %v1748_v51, %s2547_s24  ;;  %s2346_s24 = sshll.u32 %s2530_s9, 8  ;;  %s2196_s9 = scalar_lea.sflag [#allocation4], %s2657_s16 }
 0x177   : > { %v2869_v13 = vrot.slane %v1171_v58, %v2669_v29  ;;  %v1186_v63 = vrot.slane %v1172_v60, %v2669_v29  ;;  %v1195_v0 = vrot.slane %v1187_v61, %v2669_v29  ;;  %v1202_v15 = vrot.slane %v1188_v62, %v2669_v29  ;;  %s2965_s27 = scalar_lea.hbm %s3017_s1, %s2346_s24  ;;  %p2461_p0 = pneg %p2460_p12 }
 0x178   : > { %v1403_v14 = vrot.slane %v1395_v4, %v2665_v19  ;;  %v1410_v9 = vrot.slane %v1396_v5, %v2665_v19  ;;  %v1963_v16 = vrot.slane %v1955_v57, %v2669_v29  ;;  %v1995_v24 = vrot.slane %v1987_v10, %v2669_v29 }
 0x179   : > { %v1763_v27 = vrot.slane %v2324_v59, %v2665_v19  ;;  %v1779_v28 = vrot.slane %v2326_v18, %v2665_v19  ;;  %v1795_v20 = vrot.slane %v2328_v1, %v2665_v19  ;;  %v1811_v33 = vrot.slane %v2330_v6, %v2665_v19 }
 0x17a   : > { %v1443_v17 = vcombine.low %v1387_v11, %v1403_v14  ;;  %v1444_v44 = vcombine.high %v1387_v11, %v1403_v14  ;;  %v1459_v56 = vcombine.low %v1394_v12, %v1410_v9  ;;  %v1460_v23 = vcombine.high %v1394_v12, %v1410_v9  ;;  %2039 = vrot.lane.b32.xlu1 %v1749_v2, %s2546_s18 }
 0x17b   : > { %v2019_v32 = vcombine.low %v1963_v16, %v1995_v24  ;;  %v1819_v34 = vcombine.low %v1763_v27, %v1779_v28  ;;  %v2020_v59 = vcombine.high %v1963_v16, %v1995_v24  ;;  %v1851_v18 = vcombine.low %v1795_v20, %v1811_v33 }
 0x17c   : > { %v1451_v21 = vrot.slane %v1443_v17, %v2669_v29  ;;  %v1458_v22 = vrot.slane %v1444_v44, %v2669_v29  ;;  %v1467_v30 = vrot.slane %v1459_v56, %v2669_v29  ;;  %v1474_v31 = vrot.slane %v1460_v23, %v2669_v29 }
 0x17d   : > { %2087 = vrot.lane.b32.xlu0 %v2019_v32, %s2553_s30  ;;  %v1827_v53 = vrot.slane %v1819_v34, %v2669_v29  ;;  %v1956_v39 = vcombine.high %v2844_v46, %v2847_v47  ;;  %v1988_v40 = vcombine.high %v2850_v48, %v1947_v55  ;;  %v1820_v41 = vcombine.high %v1763_v27, %v1779_v28 }
 0x17e   : > { %v2333_v35 = vcombine.low %v1451_v21, %v1458_v22  ;;  %v2335_v36 = vcombine.high %v1451_v21, %v1458_v22  ;;  %v2337_v38 = vcombine.low %v1467_v30, %v1474_v31  ;;  %v2339_v52 = vcombine.high %v1467_v30, %v1474_v31 }
 0x17f   : > { %v1852_v42 = vcombine.high %v1795_v20, %v1811_v33  ;;  %v1859_v26 = vrot.slane %v1851_v18, %v2669_v29  ;;  %v1970_v49 = vrot.slane %v1956_v39, %v2669_v29  ;;  %v2002_v50 = vrot.slane %v1988_v40, %v2669_v29 }
 0x180   : > { %v1906_v43 = vrot.slane %v2333_v35, %v2665_v19  ;;  %v1922_v25 = vrot.slane %v2335_v36, %v2665_v19  ;;  %v1938_v51 = vrot.slane %v2337_v38, %v2665_v19  ;;  %v2325_v54 = vcombine.low %v2869_v13, %v1186_v63 }
 0x181   : > { %v1954_v46 = vrot.slane %v2339_v52, %v2665_v19  ;;  %v2327_v48 = vcombine.high %v2869_v13, %v1186_v63  ;;  %v2329_v55 = vcombine.low %v1195_v0, %v1202_v15  ;;  %v2331_v57 = vcombine.high %v1195_v0, %v1202_v15  ;;  %2095 = vrot.lane.b32.xlu0 %v2020_v59, %s2554_s2 }
 0x182   : > { %v1971_v47 = vcombine.low %v1906_v43, %v1922_v25  ;;  %v1883_v58 = vcombine.low %v1827_v53, %v1859_v26  ;;  %v2021_v61 = vcombine.low %v1970_v49, %v2002_v50  ;;  %v1834_v62 = vrot.slane %v1820_v41, %v2669_v29 }
 0x183   : > { %v2003_v60 = vcombine.low %v1938_v51, %v1954_v46  ;;  %v1866_v1 = vrot.slane %v1852_v42, %v2669_v29  ;;  %v1884_v3 = vcombine.high %v1827_v53, %v1859_v26  ;;  %v1770_v5 = vrot.slane %v2325_v54, %v2665_v19 }
 0x184   : > { %2085 = vrot.lane.b32.xlu1 %v1883_v58, %s2553_s30  ;;  %v1979_v4 = vrot.slane %v1971_v47, %v2669_v29  ;;  %v1611_v6 = vcombine.low %v2708_v7, %v2711_v8  ;;  %v1786_v12 = vrot.slane %v2327_v48, %v2665_v19  ;;  %v1802_v2 = vrot.slane %v2329_v55, %v2665_v19  ;;  %s2462_s30 = sshll.u32 %s2561_s29, 4  ;;  %s2463_s30 = int_to_ptr.vmem [resolvable:$false] %s2462_s30 }
 0x185   : > { %2103 = vrot.lane.b32.xlu0 %v2021_v61, %s2555_s3  ;;  %v2011_v11 = vrot.slane %v2003_v60, %v2669_v29  ;;  %v1818_v13 = vrot.slane %v2331_v57, %v2665_v19  ;;  %v2022_v14 = vcombine.high %v1970_v49, %v2002_v50  ;;  %v1885_v9 = vcombine.low %v1834_v62, %v1866_v1  ;;  %p2465_p1 = scmp.lt.s32.totalorder %s2959_s23, %s2463_s30 }
 0x186   : > { %v1835_v63 = vcombine.low %v1770_v5, %v1786_v12  ;;  %v1747_v15 = vcombine.low %v2834_v37, %v2841_v45  ;;  %v1972_v16 = vcombine.high %v1906_v43, %v1922_v25  ;;  %v2004_v17 = vcombine.high %v1938_v51, %v1954_v46 }
 0x187   : > { %v2023_v10 = vcombine.low %v1979_v4, %v2011_v11  ;;  %v1867_v0 = vcombine.low %v1802_v2, %v1818_v13  ;;  %v1886_v44 = vcombine.high %v1834_v62, %v1866_v1  ;;  %v2024_v23 = vcombine.high %v1979_v4, %v2011_v11 }
 0x188   : > { %2093 = vrot.lane.b32.xlu1 %v1884_v3, %s2554_s2  ;;  %v1843_v56 = vrot.slane %v1835_v63, %v2669_v29  ;;  %v1986_v24 = vrot.slane %v1972_v16, %v2669_v29  ;;  %v2018_v27 = vrot.slane %v2004_v17, %v2669_v29  ;;  %v1836_v37 = vcombine.high %v1770_v5, %v1786_v12  ;;  %s2464_s2 = scalar_lea.vmem %s2463_s30, 512 }
 0x189   : > { %2111 = vrot.lane.b32.xlu0 %v2022_v14, %s2556_s4  ;;  %v1875_v19 = vrot.slane %v1867_v0, %v2669_v29  ;;  %v1868_v45 = vcombine.high %v1802_v2, %v1818_v13  ;;  %p2466_p3 = scmp.lt.s32.totalorder %s2464_s2, %s2458_s28 }
 0x18a   : > { %v2025_v20 = vcombine.low %v1986_v24, %v2018_v27  ;;  %v1850_v22 = vrot.slane %v1836_v37, %v2669_v29  ;;  %v2026_v31 = vcombine.high %v1986_v24, %v2018_v27 }
 0x18b   : > { %v1887_v28 = vcombine.low %v1843_v56, %v1875_v19  ;;  %v1888_v21 = vcombine.high %v1843_v56, %v1875_v19  ;;  %v1882_v30 = vrot.slane %v1868_v45, %v2669_v29  ;;  %p2467_p5 = por %p2466_p3, %p2465_p1 }
 0x18c   : > { %2101 = vrot.lane.b32.xlu1 %v1885_v9, %s2555_s3 }
 0x18d   : > { %2119 = vrot.lane.b32.xlu0 %v2023_v10, %s2557_s5  ;;  %v1889_v32 = vcombine.low %v1850_v22, %v1882_v30  ;;  %v1890_v33 = vcombine.high %v1850_v22, %v1882_v30  ;;  %p2468_p6 = pnand %p2467_p5, %p2461_p0 }
 0x190   : > { %2109 = vrot.lane.b32.xlu1 %v1886_v44, %s2556_s4 }
 0x191   : > { %2127 = vrot.lane.b32.xlu0 %v2024_v23, %s2558_s12 }
 0x194   : > { %2117 = vrot.lane.b32.xlu1 %v1887_v28, %s2557_s5 }
 0x195   : > { %2135 = vrot.lane.b32.xlu0 %v2025_v20, %s2559_s13 }
 0x198   : > { %2125 = vrot.lane.b32.xlu1 %v1888_v21, %s2558_s12 }
 0x199   : > { %2143 = vrot.lane.b32.xlu0 %v2026_v31, %s2560_s15 }
 0x19c   : > { %2133 = vrot.lane.b32.xlu1 %v1889_v32, %s2559_s13 }
 0x1a0   : > { %2141 = vrot.lane.b32.xlu1 %v1890_v33, %s2560_s15 }
 0x1c6   : > { %v2038_v34 = vpop.permute.xlu1 %2037  ;;  %v2030_v59 = vpop.permute.xlu0 %2029 }
 0x1c7   : > { %v2148_v4 = vsel %vm2147_vm0, %v1611_v6, %v2030_v59 }
 0x1c8   : > { %v2151_v12 = vsel %vm2150_vm1, %v2148_v4, %v2038_v34 }
 0x1ca   : > { %v2046_v35 = vpop.permute.xlu1 %2045 }
 0x1cb   : > { %v2154_v13 = vsel %vm2153_vm2, %v2151_v12, %v2046_v35 }
 0x1d1   : > { %v2048_v38 = vpop.permute.xlu0 %2047 }
 0x1d8   : > { %v2054_v36 = vpop.permute.xlu1 %2053 }
 0x1d9   : > { %v2157_v14 = vsel %vm2156_vm3, %v2154_v13, %v2054_v36 }
 0x1db   : > { %v2056_v53 = vpop.permute.xlu0 %2055 }
 0x1dc   : > { %v2062_v52 = vpop.permute.xlu1 %2061 }
 0x1dd   : > { %v2160_v7 = vsel %vm2159_vm4, %v2157_v14, %v2062_v52 }
 0x1df   : > { %v2064_v39 = vpop.permute.xlu0 %2063 }
 0x1e0   : > { %v2070_v18 = vpop.permute.xlu1 %2069 }
 0x1e1   : > { %v2163_v6 = vsel %vm2162_vm5, %v2160_v7, %v2070_v18 }
 0x1e3   : > { %v2072_v41 = vpop.permute.xlu0 %2071 }
 0x1e4   : > { %v2078_v40 = vpop.permute.xlu1 %2077 }
 0x1e7   : > { %v2080_v42 = vpop.permute.xlu0 %2079 }
 0x1e8   : > { %v2032_v29 = vpop.permute.xlu1 %2031 }
 0x1e9   : > { %v2149_v25 = vsel %vm2147_vm0, %v1747_v15, %v2032_v29  ;;  %v2166_v15 = vsel %vm2165_vm6, %v2163_v6, %v2078_v40 }
 0x1ec   : > { %v2040_v43 = vpop.permute.xlu1 %2039 }
 0x1ed   : > { %v2152_v26 = vsel %vm2150_vm1, %v2149_v25, %v2040_v43 }
 0x1ee   : > { %v2155_v50 = vsel %vm2153_vm2, %v2152_v26, %v2048_v38 }
 0x1ef   : > { %v2088_v49 = vpop.permute.xlu0 %2087  ;;  %v2158_v54 = vsel %vm2156_vm3, %v2155_v50, %v2056_v53 }
 0x1f0   : > { %v2161_v48 = vsel %vm2159_vm4, %v2158_v54, %v2064_v39 }
 0x1f1   : > { %v2164_v57 = vsel %vm2162_vm5, %v2161_v48, %v2072_v41 }
 0x1f2   : > { %v2167_v61 = vsel %vm2165_vm6, %v2164_v57, %v2080_v42 }
 0x1f3   : > { %v2096_v51 = vpop.permute.xlu0 %2095  ;;  %v2170_v1 = vsel %vm2168_vm7, %v2167_v61, %v2088_v49 }
 0x1f4   : > { %v2173_v11 = vsel %vm2171_vm8, %v2170_v1, %v2096_v51 }
 0x1f6   : > { %v2086_v46 = vpop.permute.xlu1 %2085 }
 0x1f7   : > { %v2104_v47 = vpop.permute.xlu0 %2103  ;;  %v2169_v17 = vsel %vm2168_vm7, %v2166_v15, %v2086_v46 }
 0x1f8   : > { %v2176_v9 = vsel %vm2174_vm9, %v2173_v11, %v2104_v47 }
 0x1fa   : > { %v2094_v55 = vpop.permute.xlu1 %2093 }
 0x1fb   : > { %v2112_v58 = vpop.permute.xlu0 %2111  ;;  %v2172_v19 = vsel %vm2171_vm8, %v2169_v17, %v2094_v55 }
 0x1fc   : > { %v2179_v8 = vsel %vm2177_vm10, %v2176_v9, %v2112_v58 }
 0x1fe   : > { %v2102_v60 = vpop.permute.xlu1 %2101 }
 0x1ff   : > { %v2120_v62 = vpop.permute.xlu0 %2119  ;;  %v2175_v24 = vsel %vm2174_vm9, %v2172_v19, %v2102_v60 }
 0x200   : > { %v2182_v63 = vsel %vm2180_vm11, %v2179_v8, %v2120_v62 }
 0x202   : > { %v2110_v3 = vpop.permute.xlu1 %2109 }
 0x203   : > { %v2128_v5 = vpop.permute.xlu0 %2127  ;;  %v2178_v28 = vsel %vm2177_vm10, %v2175_v24, %v2110_v3 }
 0x204   : > { %v2185_v16 = vsel %vm2183_vm12, %v2182_v63, %v2128_v5 }
 0x206   : > { %v2118_v2 = vpop.permute.xlu1 %2117 }
 0x207   : > { %v2136_v10 = vpop.permute.xlu0 %2135  ;;  %v2181_v37 = vsel %vm2180_vm11, %v2178_v28, %v2118_v2 }
 0x208   : > { %v2188_v44 = vsel %vm2186_vm13, %v2185_v16, %v2136_v10 }
 0x20a   : > { %v2126_v0 = vpop.permute.xlu1 %2125 }
 0x20b   : > { %v2144_v56 = vpop.permute.xlu0 %2143  ;;  %v2184_v45 = vsel %vm2183_vm12, %v2181_v37, %v2126_v0 }
 0x20c   : > { %v2191_v23 = vsel %vm2189_vm14, %v2188_v44, %v2144_v56 }
 0x20d   : > { %2194 = vst.msk [vmem:[%s152_s22 + $0x8] sm:$0xff] %vm2192_vm15, %v2191_v23 }
 0x20e   : > { %v2134_v27 = vpop.permute.xlu1 %2133 }
 0x20f   : > { %v2187_v20 = vsel %vm2186_vm13, %v2184_v45, %v2134_v27 }
 0x212   : > { %v2142_v21 = vpop.permute.xlu1 %2141 }
 0x213   : > { %v2190_v22 = vsel %vm2189_vm14, %v2187_v20, %v2142_v21 }
 0x214   : > { %2193 = vst.msk [vmem:[%s152_s22] sm:$0xff] %vm2192_vm15, %v2190_v22 }
 0x215   : > { %2471 = shalt.err (!%p2468_p6)
}
 0x216   : > { %s2472_s3 = scalar_lea.hbm %s2965_s27, 256  ;;  %s2476_s12 = scalar_lea.hbm %s3017_s1, 512 }
 0x217   : > { %p2473_p7 = scmp.ne.s32.totalorder %s2965_s27, %s2472_s3  ;;  %p2477_p13 = scmp.lt.s32.totalorder %s2965_s27, %s3017_s1 }
 0x218   : > { %p2478_p2 = scmp.lt.s32.totalorder %s2476_s12, %s2472_s3 }
 0x219   : > { %p2474_p10 = pnand %p2473_p7, %p2624_p9 }
 0x21a   : > { %p2479_p8 = por %p2478_p2, %p2477_p13 }
 0x21b   : > { %p2475_p4 = pneg %p2474_p10 }
 0x21d   : > { %p2480_p12 = pnand %p2479_p8, %p2475_p4 }
 0x21f   : > { %2483 = shalt.err (!%p2480_p12)
}
 0x220   : > { %s2562_s17 = smov 128  }
 0x221   : > { %2349 = dma.vmem_to_hbm [thread:$0]  (%p2624_p9), %s2959_s23, 256, %s2965_s27, %s2196_s9, %s2562_s17, %s2562_s17, %s2546_s18  }
 0x222 PF: > { %s2226_s22 = sand.u32 1, %s2518_s6   ;;  %p3023_p0 = scmp.ge.s32.totalorder %s2538_s11, 2 }
 0x223   : > { %s2227_s24 = scalar_lea.sflag [#allocation4], %s2226_s22 }
 0x224   : > { %p2356_p1 = pnand %p3023_p0, %p2631_p11 }
 0x226   : > { %p2357_p3 = pneg %p2356_p1 }
 0x228   : > { %2513 = dma.done.wait (%p2357_p3), %s2227_s24, 256  }
 0x229   : > { %2515 = vsyncadd (%p2357_p3), %s2227_s24, 4294967040  ;;  %s17_s11 = sadd.s32 1, %s2538_s11   ;;  %s3024_s6 = smov %s2522_s7 }
 0x22a   : > { %p14_p5 = scmp.ge.s32.totalorder %s17_s11, 4   ;;  %s3025_s7 = smov %s2526_s8 }
 0x22b   : > { %s3026_s8 = smov %s2629_s20  ;;  %s3027_s9 = smov %s2534_s10 }
 0x22c   : > { %s3028_s10 = smov %s3030_s14  ;;  %16 = sbr.rel (!%p14_p5) target bundleno = 6 (0x6), region = 69 }
 0x231   :  { %2232 = vsyncpa [#allocation3], 1 }
 0x232   :  { %2234 = vsyncpa [#allocation3 + $0x1], 1 }
 0x233   :  { %2235 = vsyncpa [#allocation4], 1 }
 0x234   :  { %2237 = vsyncpa [#allocation4 + $0x1], 1 }

</bundles_post_ra>
